<compile_context>
chip_gen: v5e
topology: v5e:2x2
jax: 0.10.0
libtpu: 0.0.40
codegen_flags: <defaults>
</compile_context>

<pallas_src>
import math
import functools

import jax
import jax.numpy as jnp
from jax.experimental import pallas as pl
from jax.experimental.pallas import tpu as pltpu


def _round_up(x: int, m: int) -> int:
    return ((x + m - 1) // m) * m


def _time_emb_kernel(t_ref, freqs_ref, w1_ref, b1_ref, w2_ref, b2_ref, o_ref):
    """Fused sinusoidal-embedding -> Linear -> ReLU -> Linear.

    t_ref     : VMEM (TB, 1)        f32  timestep values (one batch tile)
    freqs_ref : VMEM (1, d_model)   f32  interleave-duplicated frequencies
    w1_ref    : VMEM (d_model, dim) bf16 (pre-transposed: (in, out))
    b1_ref    : VMEM (1, dim)       f32
    w2_ref    : VMEM (dim, dim)     bf16 (pre-transposed)
    b2_ref    : VMEM (1, dim)       f32
    o_ref     : VMEM (TB, dim)      f32
    """
    tb = t_ref.shape[0]
    d_model = freqs_ref.shape[1]

    # Sinusoidal features on the fly — no table, no gather DMA.
    # freqs[0, 2k] == freqs[0, 2k+1] == exp(-(2k/d_model) * ln(10000)), so
    # sin on even lanes / cos on odd lanes matches torch's interleaved table.
    ang = t_ref[...] * freqs_ref[...]                              # (TB, d_model) f32
    col = jax.lax.broadcasted_iota(jnp.int32, (tb, d_model), 1)
    x = jnp.where((col & 1) == 0, jnp.sin(ang), jnp.cos(ang))      # f32 (v5e-friendly)

    # Linear -> ReLU -> Linear.  bf16 MXU operands, f32 accumulation.
    h = jnp.dot(x.astype(jnp.bfloat16), w1_ref[...],
                preferred_element_type=jnp.float32)
    h = jnp.maximum(h + b1_ref[...], 0.0)
    y = jnp.dot(h.astype(jnp.bfloat16), w2_ref[...],
                preferred_element_type=jnp.float32)
    o_ref[...] = (y + b2_ref[...]).astype(o_ref.dtype)


def time_embedding_forward(t, w1, b1, w2, b2, *, T, tile_b=256):
    """Pallas equivalent of TimeEmbedding.forward.

    t  : (B,) integer timestep indices
    w1 : (d_model, dim) f32  -- Linear1 weight, transposed (torch stores (out, in))
    b1 : (dim,)  f32
    w2 : (dim, dim) f32      -- Linear2 weight, transposed
    b2 : (dim,)  f32
    returns (B, dim) float32
    """
    B = t.shape[0]
    d_model, dim = w1.shape
    assert d_model % 2 == 0

    # Interleave-duplicated frequency row: [f0, f0, f1, f1, ...].
    half = d_model // 2
    base = jnp.exp(-(jnp.arange(half, dtype=jnp.float32) * (2.0 / d_model))
                   * math.log(10000.0))
    freqs = jnp.repeat(base, 2).reshape(1, d_model)

    # Timesteps as an f32 column; clamp to the valid embedding range.
    t_f = jnp.clip(t, 0, T - 1).astype(jnp.float32).reshape(B, 1)

    # bf16 weights: single-pass MXU + half the weight DMA; f32 accumulation.
    w1 = w1.astype(jnp.bfloat16)
    w2 = w2.astype(jnp.bfloat16)
    b1 = jnp.asarray(b1, jnp.float32).reshape(1, dim)
    b2 = jnp.asarray(b2, jnp.float32).reshape(1, dim)

    # Batch tiling: pad B to a sublane multiple; large B gets a parallel grid
    # axis (uses both TensorCores on v7x; harmless on v5e/v6e or at small B).
    tb = min(tile_b, _round_up(B, 8))
    b_pad = _round_up(B, tb)
    if b_pad != B:
        t_f = jnp.pad(t_f, ((0, b_pad - B), (0, 0)))
    grid = (b_pad // tb,)

    flops = 2 * b_pad * d_model * dim + 2 * b_pad * dim * dim
    bytes_accessed = (t_f.size * 4 + freqs.size * 4 + w1.size * 2 + w2.size * 2
                      + b1.size * 4 + b2.size * 4 + b_pad * dim * 4)

    # TODO(synk): in the full diffusion model, keep w1/w2 resident across steps
    # (cross-call prefetch, P10) or fuse this tiny MLP into its consumer kernel
    # and batch many timesteps per call; out of scope for a standalone forward.
    out = pl.pallas_call(
        _time_emb_kernel,
        out_shape=jax.ShapeDtypeStruct((b_pad, dim), jnp.float32),
        grid=grid,
        in_specs=[
            pl.BlockSpec((tb, 1), lambda i: (i, 0)),           # t (f32 column)
            pl.BlockSpec((1, d_model), lambda i: (0, 0)),      # freqs
            pl.BlockSpec((d_model, dim), lambda i: (0, 0)),    # w1
            pl.BlockSpec((1, dim), lambda i: (0, 0)),          # b1
            pl.BlockSpec((dim, dim), lambda i: (0, 0)),        # w2
            pl.BlockSpec((1, dim), lambda i: (0, 0)),          # b2
        ],
        out_specs=pl.BlockSpec((tb, dim), lambda i: (i, 0)),
        compiler_params=pltpu.CompilerParams(
            dimension_semantics=("parallel",)),
        cost_estimate=pl.CostEstimate(
            flops=flops,
            transcendentals=2 * b_pad * d_model,
            bytes_accessed=bytes_accessed),
    )(t_f, freqs, w1, b1, w2, b2)
    return out[:B]


def build_sinusoidal_table(T: int, d_model: int) -> jnp.ndarray:
    """Reproduces the table built in TimeEmbedding.__init__ exactly (reference)."""
    assert d_model % 2 == 0
    freqs = jnp.arange(0, d_model, 2, dtype=jnp.float32) / d_model * math.log(10000.0)
    freqs = jnp.exp(-freqs)                                   # (d_model//2,)
    pos = jnp.arange(T, dtype=jnp.float32)                    # (T,)
    ang = pos[:, None] * freqs[None, :]                       # (T, d_model//2)
    emb = jnp.stack([jnp.sin(ang), jnp.cos(ang)], axis=-1)    # (T, d_model//2, 2)
    return emb.reshape(T, d_model)                            # interleaved sin/cos


def kaiming_uniform(key, out_features: int, in_features: int) -> jnp.ndarray:
    """torch.nn.init.kaiming_uniform_ with default args (a=0, fan_in); returns (in, out)."""
    bound = math.sqrt(6.0 / in_features)
    w = jax.random.uniform(key, (out_features, in_features),
                           minval=-bound, maxval=bound, dtype=jnp.float32)
    return w.T


if __name__ == "__main__":
    # Small, TPU-tile-friendly shapes implied by the module.
    T = 1000          # number of diffusion timesteps
    d_model = 128     # sinusoidal embedding width
    dim = 128         # hidden / output width
    B = 8             # batch of timestep indices

    key = jax.random.PRNGKey(0)
    k_t, k_w1, k_w2 = jax.random.split(key, 3)

    emb_table = build_sinusoidal_table(T, d_model)            # reference only
    w1 = kaiming_uniform(k_w1, dim, d_model)                  # (d_model, dim)
    b1 = jnp.zeros((dim,), jnp.float32)
    w2 = kaiming_uniform(k_w2, dim, dim)                      # (dim, dim)
    b2 = jnp.zeros((dim,), jnp.float32)

    t = jax.random.randint(k_t, (B,), 0, T, dtype=jnp.int32)

    fwd = jax.jit(functools.partial(time_embedding_forward, T=T))
    out = jax.block_until_ready(fwd(t, w1, b1, w2, b2))
    assert out.shape == (B, dim)

    # Reference built exactly like the torch module (table lookup), with the
    # SAME bf16 MXU casts as the kernel -> tight check.
    x32 = emb_table[t]
    w1b, w2b = w1.astype(jnp.bfloat16), w2.astype(jnp.bfloat16)
    h_ref = jnp.maximum(
        jnp.dot(x32.astype(jnp.bfloat16), w1b, preferred_element_type=jnp.float32)
        + b1[None, :], 0.0)
    ref_bf16 = jnp.dot(h_ref.astype(jnp.bfloat16), w2b,
                       preferred_element_type=jnp.float32) + b2[None, :]
    err_bf16 = float(jnp.max(jnp.abs(out - ref_bf16)))
    assert jnp.allclose(out, ref_bf16, atol=2e-2, rtol=2e-2), err_bf16

    # Full-precision semantic sanity check (bf16 MXU operands -> loose tolerance).
    ref_f32 = jnp.maximum(x32 @ w1 + b1[None, :], 0.0) @ w2 + b2[None, :]
    err_f32 = float(jnp.max(jnp.abs(out - ref_f32)))
    assert jnp.allclose(out, ref_f32, atol=1.5e-1, rtol=1.5e-1), err_f32

    print("KERNEL_OK")
</pallas_src>

<mosaic_0001>
module attributes {stable_mosaic.version = 11 : i64} {
  func.func @_time_emb_kernel(%arg0: i32, %arg1: memref<8x1xf32, #tpu.memory_space<vmem>>, %arg2: memref<1x128xf32, #tpu.memory_space<vmem>>, %arg3: memref<128x128xbf16, #tpu.memory_space<vmem>>, %arg4: memref<1x128xf32, #tpu.memory_space<vmem>>, %arg5: memref<128x128xbf16, #tpu.memory_space<vmem>>, %arg6: memref<1x128xf32, #tpu.memory_space<vmem>>, %arg7: memref<8x128xf32, #tpu.memory_space<vmem>>) attributes {dimension_semantics = [#tpu.dimension_semantics<parallel>], iteration_bounds = array<i64: 1>, scalar_prefetch = 0 : i64, scratch_operands = 0 : i64, tpu.core_type = #tpu.core_type<tc>, window_params = [{transform_indices = @transform_0, window_bounds = array<i64: 8, 1>}, {pipeline_mode = #tpu.pipeline_mode<synchronous>, transform_indices = @transform_1, window_bounds = array<i64: 1, 128>}, {pipeline_mode = #tpu.pipeline_mode<synchronous>, transform_indices = @transform_2, window_bounds = array<i64: 128, 128>}, {pipeline_mode = #tpu.pipeline_mode<synchronous>, transform_indices = @transform_3, window_bounds = array<i64: 1, 128>}, {pipeline_mode = #tpu.pipeline_mode<synchronous>, transform_indices = @transform_4, window_bounds = array<i64: 128, 128>}, {pipeline_mode = #tpu.pipeline_mode<synchronous>, transform_indices = @transform_5, window_bounds = array<i64: 1, 128>}, {transform_indices = @transform_6, window_bounds = array<i64: 8, 128>}]} {
    %c0 = arith.constant 0 : index
    %c0_0 = arith.constant 0 : index
    %0 = vector.load %arg1[%c0, %c0_0] : memref<8x1xf32, #tpu.memory_space<vmem>>, vector<8x1xf32>
    %c0_1 = arith.constant 0 : index
    %c0_2 = arith.constant 0 : index
    %1 = vector.load %arg2[%c0_1, %c0_2] : memref<1x128xf32, #tpu.memory_space<vmem>>, vector<1x128xf32>
    %2 = vector.broadcast %0 : vector<8x1xf32> to vector<8x128xf32>
    %3 = vector.broadcast %1 : vector<1x128xf32> to vector<8x128xf32>
    %4 = arith.mulf %2, %3 : vector<8x128xf32>
    %5 = tpu.iota {dimensions = array<i32: 1>} : vector<8x128xi32>
    %c1_i32 = arith.constant 1 : i32
    %6 = vector.broadcast %c1_i32 : i32 to vector<8x128xi32>
    %7 = arith.andi %5, %6 : vector<8x128xi32>
    %c0_i32 = arith.constant 0 : i32
    %8 = vector.broadcast %c0_i32 : i32 to vector<8x128xi32>
    %9 = arith.cmpi eq, %7, %8 : vector<8x128xi32>
    %10 = math.sin %4 : vector<8x128xf32>
    %11 = math.cos %4 : vector<8x128xf32>
    %12 = arith.select %9, %10, %11 : vector<8x128xi1>, vector<8x128xf32>
    %13 = arith.truncf %12 : vector<8x128xf32> to vector<8x128xbf16>
    %c0_3 = arith.constant 0 : index
    %c0_4 = arith.constant 0 : index
    %14 = vector.load %arg3[%c0_3, %c0_4] : memref<128x128xbf16, #tpu.memory_space<vmem>>, vector<128x128xbf16>
    %cst = arith.constant dense<0.000000e+00> : vector<8x128xf32>
    %15 = tpu.matmul %13, %14, %cst {dimension_numbers = #tpu.dot_dimension_numbers<[1], [0], [0], [1], [0, 0, 1, 1], [], []>} : vector<8x128xbf16>, vector<128x128xbf16>, vector<8x128xf32> -> vector<8x128xf32>
    %c0_5 = arith.constant 0 : index
    %c0_6 = arith.constant 0 : index
    %16 = vector.load %arg4[%c0_5, %c0_6] : memref<1x128xf32, #tpu.memory_space<vmem>>, vector<1x128xf32>
    %17 = vector.broadcast %16 : vector<1x128xf32> to vector<8x128xf32>
    %18 = arith.addf %15, %17 : vector<8x128xf32>
    %cst_7 = arith.constant 0.000000e+00 : f32
    %19 = vector.broadcast %cst_7 : f32 to vector<8x128xf32>
    %20 = arith.maximumf %18, %19 : vector<8x128xf32>
    %21 = arith.truncf %20 : vector<8x128xf32> to vector<8x128xbf16>
    %c0_8 = arith.constant 0 : index
    %c0_9 = arith.constant 0 : index
    %22 = vector.load %arg5[%c0_8, %c0_9] : memref<128x128xbf16, #tpu.memory_space<vmem>>, vector<128x128xbf16>
    %cst_10 = arith.constant dense<0.000000e+00> : vector<8x128xf32>
    %23 = tpu.matmul %21, %22, %cst_10 {dimension_numbers = #tpu.dot_dimension_numbers<[1], [0], [0], [1], [0, 0, 1, 1], [], []>} : vector<8x128xbf16>, vector<128x128xbf16>, vector<8x128xf32> -> vector<8x128xf32>
    %c0_11 = arith.constant 0 : index
    %c0_12 = arith.constant 0 : index
    %24 = vector.load %arg6[%c0_11, %c0_12] : memref<1x128xf32, #tpu.memory_space<vmem>>, vector<1x128xf32>
    %25 = vector.broadcast %24 : vector<1x128xf32> to vector<8x128xf32>
    %26 = arith.addf %23, %25 : vector<8x128xf32>
    %c0_13 = arith.constant 0 : index
    %c0_14 = arith.constant 0 : index
    %27 = vector.load %arg7[%c0_13, %c0_14] : memref<8x128xf32, #tpu.memory_space<vmem>>, vector<8x128xf32>
    tpu.vector_store %arg7[%c0_13, %c0_14], %26 {strides = array<i32>} : memref<8x128xf32, #tpu.memory_space<vmem>>, vector<8x128xf32>,
    return
  }
  func.func @transform_0(%arg0: i32) -> (i32, i32) {
    %c0_i32 = arith.constant 0 : i32
    %c0_i32_0 = arith.constant 0 : i32
    return %arg0, %c0_i32 : i32, i32
  }
  func.func @transform_1(%arg0: i32) -> (i32, i32) {
    %c0_i32 = arith.constant 0 : i32
    %c0_i32_0 = arith.constant 0 : i32
    %c0_i32_1 = arith.constant 0 : i32
    return %c0_i32, %c0_i32_0 : i32, i32
  }
  func.func @transform_2(%arg0: i32) -> (i32, i32) {
    %c0_i32 = arith.constant 0 : i32
    %c0_i32_0 = arith.constant 0 : i32
    %c0_i32_1 = arith.constant 0 : i32
    return %c0_i32, %c0_i32_0 : i32, i32
  }
  func.func @transform_3(%arg0: i32) -> (i32, i32) {
    %c0_i32 = arith.constant 0 : i32
    %c0_i32_0 = arith.constant 0 : i32
    %c0_i32_1 = arith.constant 0 : i32
    return %c0_i32, %c0_i32_0 : i32, i32
  }
  func.func @transform_4(%arg0: i32) -> (i32, i32) {
    %c0_i32 = arith.constant 0 : i32
    %c0_i32_0 = arith.constant 0 : i32
    %c0_i32_1 = arith.constant 0 : i32
    return %c0_i32, %c0_i32_0 : i32, i32
  }
  func.func @transform_5(%arg0: i32) -> (i32, i32) {
    %c0_i32 = arith.constant 0 : i32
    %c0_i32_0 = arith.constant 0 : i32
    %c0_i32_1 = arith.constant 0 : i32
    return %c0_i32, %c0_i32_0 : i32, i32
  }
  func.func @transform_6(%arg0: i32) -> (i32, i32) {
    %c0_i32 = arith.constant 0 : i32
    %c0_i32_0 = arith.constant 0 : i32
    return %arg0, %c0_i32 : i32, i32
  }
}

</mosaic_0001>

<bundles_post_ra>
// kernel: time_embedding_forward.1
= control target key start
LH: loop header
LB: loop body
LE: loop exit
PB: predicated region body
PF: predicated region fallthrough
CT: control target
= control target key end

     0   :  { %v655_v1 = vmov 0   ;;  %s828_s0 = inlined_call_operand.vmem [shape: f32[8,1], index: 0, kind: input, shape index: {}]   ;;  %s829_s1 = inlined_call_operand.vmem [shape: f32[1,128], index: 1, kind: input, shape index: {}]   ;;  %s830_s2 = inlined_call_operand.vmem [shape: bf16[128,128], index: 2, kind: input, shape index: {}]   ;;  %s831_s3 = inlined_call_operand.vmem [shape: f32[1,128], index: 3, kind: input, shape index: {}]   ;;  %s832_s4 = inlined_call_operand.vmem [shape: bf16[128,128], index: 4, kind: input, shape index: {}]   ;;  %s833_s5 = inlined_call_operand.vmem [shape: f32[1,128], index: 5, kind: input, shape index: {}]   ;;  %s834_s6 = inlined_call_operand.hbm [shape: f32[8,128], index: 6, kind: output, shape index: {}]  }
   0x1   :  { %v24_v0 = vld [vmem:[%s828_s0] sm:$0xff]  ;;  %625 = vset.pattern.permute.xlu0 %v655_v1 }
   0x2   :  { %28 = vperm.xlu0 %625, %v24_v0  }
   0x3   :  { %11 = vsyncpa [#allocation3], 0  ;;  %v626_v2 = vld [vmem:[%s829_s1] ss:$0 sm:$0xff]  ;;  %v608_v5 = vld [vmem:[%s830_s2 + $0x38] sm:$0xff]  ;;  %s662_s8 = smov [#allocation2]  }
   0x4   :  { %418 = vmatpush.bf16.msra.mxu0 %v608_v5  ;;  %v607_v7 = vld [vmem:[%s830_s2 + $0x30] sm:$0xff]  ;;  %v606_v10 = vld [vmem:[%s830_s2 + $0x28] sm:$0xff]  ;;  %v605_v13 = vld [vmem:[%s830_s2 + $0x20] sm:$0xff]  ;;  %v656_v21 = vmov 683565275   ;;  %s520_s9 = sshll.u32 %s662_s8, 4  ;;  %s521_s9 = int_to_ptr.vmem [resolvable:$true] %s520_s9 }
   0x5   :  { %v604_v18 = vld [vmem:[%s830_s2 + $0x18] sm:$0xff]  ;;  %v657_v23 = vmov 2475754826   ;;  %v658_v26 = vmov 2131351028   ;;  %v603_v40 = vld [vmem:[%s830_s2 + $0x10] sm:$0xff] }
   0x6   :  { %v659_v29 = vmov 2102212464   ;;  %v660_v32 = vmov 920167782   ;;  %v661_v35 = vmov 1326507024  }
   0x7   :  { %v602_v50 = vld [vmem:[%s830_s2 + $0x8] sm:$0xff]  ;;  %v601_v61 = vld [vmem:[%s830_s2] sm:$0xff] }
   0x8   :  { %419 = vmatpush.bf16.msra.mxu0 %v607_v7 }
   0xc   :  { %420 = vmatpush.bf16.msra.mxu0 %v606_v10 }
  0x10   :  { %421 = vmatpush.bf16.msra.mxu0 %v605_v13 }
  0x14   :  { %422 = vmatpush.bf16.msra.mxu0 %v604_v18 }
  0x18   :  { %423 = vmatpush.bf16.msra.mxu0 %v603_v40 }
  0x1c   :  { %424 = vmatpush.bf16.msra.mxu0 %v602_v50 }
  0x20   :  { %425 = vmatpush.bf16.msra.mxu0 %v601_v61 }
  0x74   :  { %v29_v3 = vpop.permute.xlu0 %28 }
  0x75   :  { %v705_v4 = vmul.f32 %v626_v2, %v29_v3 }
  0x77   :  { %v42_v6 = vand.u32 2139095040, %v705_v4  ;;  %v39_v11 = vand.u32 2147483647, %v705_v4  ;;  %vm41_vm12 = vcmp.lt.s32.totalorder %v705_v4, 0 }
  0x79   :  { %v43_v8 = vshrl.u32 %v42_v6, 23  ;;  %v46_v14 = vand.u32 8388607, %v39_v11  ;;  %vm40_vm13 = vcmp.le.f32.partialorder %v39_v11, 0.7853982 }
  0x7b   :  { %v531_v9 = vadd.s32 4294967169, %v43_v8  ;;  %v47_v19 = vor.u32 8388608, %v46_v14 }
  0x7d   :  { %v49_v12 = vadd.s32 1, %v531_v9  ;;  %v740_v43 = vshll.u32 %v47_v19, 8 }
  0x7f   :  { %vm50_vm0 = vcmp.gt.s32.totalorder %v49_v12, 0  ;;  %v88_v53 = vand.u32 65535, %v740_v43  ;;  %v89_v54 = vshrl.u32 %v740_v43, 16 }
  0x80   :  { %v51_v15 = vsel %vm50_vm0, %v49_v12, 0 }
  0x81   :  { %v53_v16 = vand.u32 31, %v51_v15  ;;  %v728_v20 = vshrl.u32 %v51_v15, 5 }
  0x83   :  { %v723_v17 = vsub.s32 32, %v53_v16  ;;  %v56_v22 = vshll.u32 %v656_v21, %v53_v16  ;;  %v59_v24 = vshll.u32 %v657_v23, %v53_v16  ;;  %v62_v28 = vshll.u32 %v658_v26, %v53_v16 }
  0x84   :  { %v65_v31 = vshll.u32 %v659_v29, %v53_v16  ;;  %v68_v34 = vshll.u32 %v660_v32, %v53_v16  ;;  %vm71_vm1 = vcmp.lt.s32.totalorder %v728_v20, 1  ;;  %vm74_vm2 = vcmp.lt.s32.totalorder %v728_v20, 4 }
  0x85   :  { %v57_v25 = vshrl.u32 %v657_v23, %v723_v17  ;;  %v60_v27 = vshrl.u32 %v658_v26, %v723_v17  ;;  %v63_v30 = vshrl.u32 %v659_v29, %v723_v17  ;;  %v66_v33 = vshrl.u32 %v660_v32, %v723_v17 }
  0x86   :  { %v69_v36 = vshrl.u32 %v661_v35, %v723_v17  ;;  %vm73_vm3 = vcmp.lt.s32.totalorder %v728_v20, 3  ;;  %vm72_vm4 = vcmp.lt.s32.totalorder %v728_v20, 2 }
  0x87   :  { %v58_v37 = vor.u32 %v57_v25, %v56_v22  ;;  %v61_v38 = vor.u32 %v60_v27, %v59_v24  ;;  %v64_v39 = vor.u32 %v63_v30, %v62_v28  ;;  %v67_v41 = vor.u32 %v66_v33, %v65_v31 }
  0x88   :  { %v70_v42 = vor.u32 %v69_v36, %v68_v34  ;;  %v55_v22 = vshrl.u32 %v656_v21, %v723_v17 }
  0x89   :  { %v79_v44 = vsel %vm71_vm1, %v58_v37, %v61_v38  ;;  %v83_v45 = vsel %vm71_vm1, %v61_v38, %v64_v39  ;;  %v80_v46 = vsel %vm74_vm2, %v67_v41, 920167782  ;;  %v76_v16 = vsel %vm74_vm2, %v64_v39, 2102212464 }
  0x8a   :  { %v84_v47 = vsel %vm74_vm2, %v70_v42, 1326507024  ;;  %v81_v48 = vsel %vm73_vm3, %v64_v39, %v80_v46  ;;  %v75_v28 = vsel %vm71_vm1, %v55_v22, %v58_v37  ;;  %v77_v29 = vsel %vm73_vm3, %v61_v38, %v76_v16 }
  0x8b   :  { %v85_v49 = vsel %vm73_vm3, %v67_v41, %v84_v47  ;;  %v82_v51 = vsel %vm72_vm4, %v79_v44, %v81_v48  ;;  %v78_v17 = vsel %vm72_vm4, %v75_v28, %v77_v29 }
  0x8c   :  { %v86_v52 = vsel %vm72_vm4, %v83_v45, %v85_v49  ;;  %v112_v57 = vand.u32 65535, %v82_v51  ;;  %v113_v58 = vshrl.u32 %v82_v51, 16  ;;  %v132_v36 = vmul.u32 %v740_v43, %v78_v17 }
  0x8d   :  { %v90_v55 = vand.u32 65535, %v86_v52  ;;  %v91_v56 = vshrl.u32 %v86_v52, 16 }
  0x8e   :  { %v115_v62 = vmul.u32 %v113_v58, %v88_v53  ;;  %v116_v63 = vmul.u32 %v112_v57, %v89_v54  ;;  %v114_v5 = vmul.u32 %v112_v57, %v88_v53  ;;  %v117_v9 = vmul.u32 %v113_v58, %v89_v54  ;;  %v616_v58 = vld [vmem:[%s832_s4 + $0x38] sm:$0xff] }
  0x8f   :  { %v93_v59 = vmul.u32 %v91_v56, %v88_v53  ;;  %v94_v60 = vmul.u32 %v90_v55, %v89_v54  ;;  %v92_v0 = vmul.u32 %v90_v55, %v88_v53  ;;  %v95_v3 = vmul.u32 %v91_v56, %v89_v54  ;;  %501 = vmatpush.bf16.msra.mxu1 %v616_v58 }
  0x90   :  { %v118_v6 = vshll.u32 %v115_v62, 16  ;;  %v120_v12 = vshll.u32 %v116_v63, 16  ;;  %v119_v26 = vshrl.u32 %v115_v62, 16  ;;  %v121_v32 = vshrl.u32 %v116_v63, 16  ;;  %v614_v63 = vld [vmem:[%s832_s4 + $0x28] sm:$0xff] }
  0x91   :  { %v96_v2 = vshll.u32 %v93_v59, 16  ;;  %v98_v7 = vshll.u32 %v94_v60, 16  ;;  %v97_v23 = vshrl.u32 %v93_v59, 16  ;;  %v99_v30 = vshrl.u32 %v94_v60, 16  ;;  %v615_v60 = vld [vmem:[%s832_s4 + $0x30] sm:$0xff] }
  0x92   :  { %vm122_vm6 = vc.u32 %v114_v5, %v118_v6  ;;  %v124_v13 = vadd.s32 %v118_v6, %v114_v5 }
  0x93   :  { %vm100_vm5 = vc.u32 %v92_v0, %v96_v2  ;;  %v102_v8 = vadd.s32 %v96_v2, %v92_v0  ;;  %v123_v15 = vsel %vm122_vm6, 1, %v655_v1  ;;  %502 = vmatpush.bf16.msra.mxu1 %v615_v60 }
  0x94   :  { %v101_v10 = vsel %vm100_vm5, 1, %v655_v1  ;;  %v125_v19 = vadd.s32 %v123_v15, %v117_v9  ;;  %vm126_vm8 = vc.u32 %v124_v13, %v120_v12  ;;  %v128_v35 = vadd.s32 %v124_v13, %v120_v12  ;;  %v612_v15 = vld [vmem:[%s832_s4 + $0x18] sm:$0xff] }
  0x95   :  { %v103_v14 = vadd.s32 %v101_v10, %v95_v3  ;;  %vm104_vm7 = vc.u32 %v102_v8, %v98_v7  ;;  %v127_v25 = vsel %vm126_vm8, 1, %v655_v1  ;;  %v613_v7 = vld [vmem:[%s832_s4 + $0x20] sm:$0xff]  ;;  %v35_v9 = vlaneseq }
  0x96   :  { %v105_v18 = vsel %vm104_vm7, 1, %v655_v1  ;;  %v129_v27 = vadd.s32 %v127_v25, %v125_v19  ;;  %v611_v25 = vld [vmem:[%s832_s4 + $0x10] sm:$0xff]  ;;  %vm182_vm5 = vweird.f32 %v705_v4 }
  0x97   :  { %v107_v24 = vadd.s32 %v105_v18, %v103_v14  ;;  %503 = vmatpush.bf16.msra.mxu1 %v614_v63  ;;  %v36_v16 = vand.u32 127, %v35_v9 }
  0x98   :  { %v130_v33 = vadd.s32 %v129_v27, %v119_v26 }
  0x99   :  { %v108_v31 = vadd.s32 %v107_v24, %v97_v23  ;;  %v37_v26 = vand.u32 1, %v36_v16 }
  0x9a   :  { %v131_v21 = vadd.s32 %v130_v33, %v121_v32 }
  0x9b   :  { %v109_v34 = vadd.s32 %v108_v31, %v99_v30  ;;  %504 = vmatpush.bf16.msra.mxu1 %v613_v7  ;;  %vm806_vm14 = vcmp.eq.s32.totalorder %v37_v26, 0 }
  0x9c   :  { %v135_v1 = vadd.s32 1, %v131_v21 }
  0x9d   :  { %vm134_vm9 = vc.u32 %v109_v34, %v128_v35  ;;  %v133_v20 = vadd.s32 %v128_v35, %v109_v34 }
  0x9e   :  { %v136_v39 = vsel %vm134_vm9, %v135_v1, %v131_v21 }
  0x9f   :  { %v137_v40 = vadd.s32 %v136_v39, %v132_v36  ;;  %505 = vmatpush.bf16.msra.mxu1 %v612_v15 }
  0xa1   :  { %v138_v37 = vadd.s32 536870912, %v137_v40 }
  0xa3   :  { %v139_v41 = vshrl.u32 %v138_v37, 30  ;;  %506 = vmatpush.bf16.msra.mxu1 %v611_v25 }
  0xa5   :  { %v140_v42 = vshll.u32 %v139_v41, 30  ;;  %v163_v0 = vsub.s32 4, %v139_v41 }
  0xa7   :  { %v141_v38 = vsub.s32 %v137_v40, %v140_v42  ;;  %v164_v8 = vsel %vm41_vm12, %v163_v0, %v139_v41 }
  0xa8   :  { %v166_v12 = vsel %vm40_vm13, 0, %v164_v8 }
  0xa9   :  { %vm142_vm10 = vcmp.lt.s32.totalorder %v141_v38, 0  ;;  %v143_v44 = vsub.s32 0, %v141_v38  ;;  %v183_v22 = vadd.s32 3, %v166_v12  ;;  %v338_v29 = vand.u32 3, %v166_v12 }
  0xab   :  { %v144_v45 = vsel %vm142_vm10, %v143_v44, %v141_v38  ;;  %v184_v30 = vand.u32 3, %v183_v22  ;;  %vm339_vm15 = vcmp.lt.s32.totalorder %v338_v29, 2  ;;  %vm340_vm0 = vcmp.eq.s32.totalorder %v338_v29, 0  ;;  %v609_v44 = vld [vmem:[%s832_s4] sm:$0xff] }
  0xac   :  { %v145_v46 = vclz %v144_v45  ;;  %vm343_vm4 = vcmp.eq.s32.totalorder %v338_v29, 2 }
  0xad   :  { %vm185_vm1 = vcmp.lt.s32.totalorder %v184_v30, 2  ;;  %vm186_vm2 = vcmp.eq.s32.totalorder %v184_v30, 0  ;;  %vm189_vm3 = vcmp.eq.s32.totalorder %v184_v30, 2 }
  0xae   :  { %v532_v47 = vadd.s32 4294967294, %v145_v46 }
  0xb0   :  { %vm533_vm11 = vcmp.lt.s32.totalorder %v532_v47, 0 }
  0xb1   :  { %v148_v48 = vsel %vm533_vm11, 0, %v532_v47 }
  0xb2   :  { %v149_v49 = vsub.s32 32, %v148_v48  ;;  %v153_v50 = vsub.s32 4294967266, %v148_v48  ;;  %v150_v51 = vshll.u32 %v141_v38, %v148_v48  ;;  %v610_v38 = vld [vmem:[%s832_s4 + $0x8] sm:$0xff]  ;;  %s522_s4 = sshll.u32 %s834_s6, 4  ;;  %s523_s4 = int_to_ptr.hbm [resolvable:$true] %s522_s4 }
  0xb3   :  { %507 = vmatpush.bf16.msra.mxu1 %v610_v38 }
  0xb4   :  { %v151_v52 = vshrl.u32 %v133_v20, %v149_v49  ;;  %v154_v53 = vadd.s32 127, %v153_v50  ;;  %v628_v49 = vld [vmem:[%s833_s5] ss:$0 sm:$0xff] }
  0xb6   :  { %v152_v43 = vor.u32 %v151_v52, %v150_v51  ;;  %v155_v54 = vshll.u32 %v154_v53, 23 }
  0xb7   :  { %508 = vmatpush.bf16.msra.mxu1 %v609_v44 }
  0xb8   :  { %v156_v55 = vor.u32 4788187, %v155_v54  ;;  %v159_v57 = vcvt.s32.f32 %v152_v43 }
  0xba   :  { %v157_v56 = vand.u32 2147483647, %v156_v55 }
  0xbc   :  { %v160_v59 = vmul.f32 %v159_v57, %v157_v56 }
  0xbe   :  { %v161_v61 = vxor.u32 2147483648, %v160_v59 }
  0xc0   :  { %v162_v62 = vsel %vm41_vm12, %v161_v61, %v160_v59 }
  0xc1   :  { %v165_v2 = vsel %vm40_vm13, %v705_v4, %v162_v62  ;;  %v627_v4 = vld [vmem:[%s831_s3] ss:$0 sm:$0xff] }
  0xc2   :  { %v167_v3 = vmul.f32 %v165_v2, %v165_v2 }
  0xc4   :  { %v168_v5 = vmul.f32 -0.001358992, %v167_v3  ;;  %v175_v6 = vmul.f32 -0.00019511016, %v167_v3 }
  0xc6   :  { %v169_v11 = vadd.f32 0.041655596, %v168_v5  ;;  %v176_v10 = vadd.f32 0.008332121, %v175_v6 }
  0xc8   :  { %v170_v13 = vmul.f32 %v169_v11, %v167_v3  ;;  %v177_v14 = vmul.f32 %v176_v10, %v167_v3 }
  0xca   :  { %v171_v18 = vadd.f32 -0.4999988, %v170_v13  ;;  %v178_v19 = vadd.f32 -0.16666654, %v177_v14 }
  0xcc   :  { %v172_v23 = vmul.f32 %v171_v18, %v167_v3  ;;  %v179_v24 = vmul.f32 %v178_v19, %v167_v3 }
  0xce   :  { %v173_v27 = vadd.f32 1.0, %v172_v23  ;;  %v180_v28 = vadd.f32 1.0, %v179_v24 }
  0xd0   :  { %v181_v31 = vmul.f32 %v180_v28, %v165_v2  ;;  %v190_v32 = vxor.u32 2147483648, %v173_v27 }
  0xd2   :  { %v187_v34 = vxor.u32 2147483648, %v181_v31  ;;  %v191_v17 = vsel %vm189_vm3, %v190_v32, %v181_v31  ;;  %v345_v1 = vsel %vm343_vm4, %v190_v32, %v181_v31 }
  0xd4   :  { %v188_v35 = vsel %vm186_vm2, %v173_v27, %v187_v34  ;;  %v342_v21 = vsel %vm340_vm0, %v173_v27, %v187_v34 }
  0xd5   :  { %v192_v36 = vsel %vm185_vm1, %v188_v35, %v191_v17  ;;  %v346_v39 = vsel %vm339_vm15, %v342_v21, %v345_v1 }
  0xd6   :  { %v193_v40 = vsel %vm182_vm5, nan, %v192_v36  ;;  %v347_v37 = vsel %vm182_vm5, nan, %v346_v39 }
  0xd7   :  { %v348_v41 = vsel %vm806_vm14, %v193_v40, %v347_v37 }
  0xd8   :  { %v349_v42 = vpack.c.bf16 %v348_v41, %v348_v41 }
  0xda   :  { %426 = vmatmul.bf16.vlgmr.msra.gmra.mxu0 %v349_v42 }
 0x157   :  { %v427_v45 = vpop.f32.mrf.mxu0 }
 0x158   :  { %v428_v46 = vadd.f32 %v627_v4, %v427_v45 }
 0x15a   :  { %v431_v47 = vmax.f32 %v428_v46, 0.0 }
 0x15c   :  { %v432_v48 = vpack.c.bf16 %v431_v47, %v431_v47 }
 0x15e   :  { %509 = vmatmul.bf16.vlgmr.msra.gmra.mxu1 %v432_v48 }
 0x15f   :  { %v429_v20 = vpop.f32.mrf.mxu0 }
 0x1db   :  { %v510_v50 = vpop.f32.mrf.mxu1 }
 0x1dc   :  { %v511_v51 = vadd.f32 %v628_v49, %v510_v50 }
 0x1de   :  { %514 = vst [vmem:[#allocation2] sm:$0xff] %v511_v51 }
 0x1df   :  { %525 = dma.vmem_to_hbm [thread:$0]  %s521_s9, 128, %s523_s4, [#allocation3]  }
 0x1e3   :  { %v512_v52 = vpop.f32.mrf.mxu1 }
 0x1e4   :  { %653 = dma.done.wait [#allocation3], 128  }
 0x1e5   :  { %654 = vsyncadd [#allocation3], 4294967168 }
 0x1e6   :  { %530 = vsyncpa [#allocation3], 1 }

</bundles_post_ra>
